<compile_context>
chip_gen: v5e
topology: v5e:2x2
jax: 0.10.0
libtpu: 0.0.40
codegen_flags: <defaults>
</compile_context>

<pallas_src>
import functools

import jax
import jax.numpy as jnp
import numpy as np
from jax.experimental import pallas as pl
from jax.experimental.pallas import tpu as pltpu

_BF16 = jnp.bfloat16


def _layernorm(v, gamma, beta, eps=1e-5):
    mu = jnp.mean(v, axis=-1, keepdims=True)
    var = jnp.mean((v - mu) ** 2, axis=-1, keepdims=True)
    return (v - mu) * jax.lax.rsqrt(var + eps) * gamma + beta


def _pick_tile(n, target):
    """Largest divisor of n that is <= target, preferring multiples of 8."""
    if n <= target:
        return n
    for t in range(min(target, n), 0, -1):
        if n % t == 0 and t % 8 == 0:
            return t
    for t in range(min(target, n), 0, -1):
        if n % t == 0:
            return t
    return n


def _vmem_capacity_bytes():
    try:
        info = pltpu.get_tpu_info()
        cap = getattr(info, "vmem_capacity_bytes", None)
        if cap:
            return int(cap)
    except Exception:
        pass
    return 64 * 1024 * 1024  # conservative default (v7x per-core VMEM)


def _vmem_limit(needed_bytes):
    ceiling = _vmem_capacity_bytes() - 2 * 1024 * 1024
    return int(min(ceiling, max(32 * 1024 * 1024, 2 * int(needed_bytes))))


# --------------------------------------------------------------------------
# Kernel A: LN1 + fused QKV projection (scale pre-folded into Q weight cols).
# --------------------------------------------------------------------------
def _ln_qkv_kernel(x_ref, g_ref, b_ref, wqkv_ref, qkv_ref):
    xn = _layernorm(x_ref[0].astype(jnp.float32), g_ref[...], b_ref[...])
    qkv = jnp.dot(xn.astype(_BF16), wqkv_ref[...],
                  preferred_element_type=jnp.float32)          # (tn, 3C) f32
    qkv_ref[0] = qkv.astype(_BF16)


# --------------------------------------------------------------------------
# Kernel B: attention (per query tile) + output projection + residual +
#           LN2 + MLP + residual.
# --------------------------------------------------------------------------
def _attn_mlp_kernel(x_ref, q_ref, k_ref, v_ref,
                     wproj_ref, bproj_ref,
                     ln2_g_ref, ln2_b_ref,
                     w1_ref, b1_ref,
                     w2_ref, b2_ref,
                     o_ref, *, num_heads):
    x_tile = x_ref[0].astype(jnp.float32)                      # (tq, C)

    # ---- multi-head attention; head-major refs -> leading-dim indexing ----
    # TODO(synk): for very long N on v7x (64 MiB VMEM), replace the resident
    # (H, N, hd) K/V blocks with an online-softmax (flash) loop over KV tiles.
    heads = []
    for h in range(num_heads):
        q_h = q_ref[0, h]                                       # (tq, hd) bf16, pre-scaled
        k_h = k_ref[0, h]                                       # (N,  hd) bf16
        v_h = v_ref[0, h]                                       # (N,  hd) bf16
        s = jax.lax.dot_general(
            q_h, k_h, dimension_numbers=(((1,), (1,)), ((), ())),
            preferred_element_type=jnp.float32)                 # (tq, N) f32
        s = s - jnp.max(s, axis=-1, keepdims=True)
        p = jnp.exp(s)
        p = p * pl.reciprocal(jnp.sum(p, axis=-1, keepdims=True), approx=True)
        o_h = jnp.dot(p.astype(_BF16), v_h,
                      preferred_element_type=jnp.float32)       # (tq, hd)
        heads.append(o_h.astype(_BF16))

    attn = jnp.concatenate(heads, axis=-1)                      # (tq, C) bf16
    # Single full-K output projection (one MXU pass with K=C).
    proj = jnp.dot(attn, wproj_ref[...], preferred_element_type=jnp.float32)
    x1 = x_tile + proj + bproj_ref[...]                         # residual 1

    # ---- LN2 + MLP (linear1 -> relu -> linear2) ----
    xn2 = _layernorm(x1, ln2_g_ref[...], ln2_b_ref[...])
    h1 = jnp.dot(xn2.astype(_BF16), w1_ref[...],
                 preferred_element_type=jnp.float32) + b1_ref[...]
    h1 = jnp.maximum(h1, 0.0)                                   # ReLU
    mlp = jnp.dot(h1.astype(_BF16), w2_ref[...],
                  preferred_element_type=jnp.float32) + b2_ref[...]

    o_ref[0] = (x1 + mlp).astype(o_ref.dtype)                   # residual 2


def transformer_block(x, params, *, num_heads, q_tile=256):
    B, N, C = x.shape
    hd = C // num_heads
    scale = float(hd) ** -0.5

    tn = _pick_tile(N, q_tile)      # sequence tile for LN1+QKV
    tq = _pick_tile(N, q_tile)      # query tile for attention/MLP

    # Fold the attention scale into the Q columns of the fused QKV weight
    # (host side, f32), then cast all weights to bf16 for the MXU.
    col_scale = jnp.concatenate(
        [jnp.full((C,), scale, jnp.float32), jnp.ones((2 * C,), jnp.float32)])
    wqkv = (params["wqkv"] * col_scale[None, :]).astype(_BF16)
    wproj = params["wproj"].astype(_BF16)
    w1 = params["w1"].astype(_BF16)
    w2 = params["w2"].astype(_BF16)

    def const_spec(shape):
        return pl.BlockSpec(shape, lambda b, i: (0,) * len(shape))

    def weight_spec(shape):
        # Block index never changes -> single-buffer to halve weight VMEM.
        return pl.BlockSpec(shape, lambda b, i: (0,) * len(shape),
                            pipeline_mode=pl.Buffered(1))

    # ---------------- pass 1: LN1 + QKV projection ----------------
    flops_a = 2 * B * N * C * 3 * C + 10 * B * N * C
    bytes_a = B * N * C * 4 + 6 * C * C + 2 * C * 4 + B * N * 3 * C * 2
    vmem_a = (2 * (tn * C * 4 + tn * 3 * C * 2)      # x in + qkv out (double buf)
              + 6 * C * C                            # wqkv bf16 (single buf)
              + 4 * C * 4 + tn * 3 * C * 4)          # params + f32 transient

    qkv_flat = pl.pallas_call(
        _ln_qkv_kernel,
        out_shape=jax.ShapeDtypeStruct((B, N, 3 * C), _BF16),
        grid_spec=pltpu.PrefetchScalarGridSpec(
            num_scalar_prefetch=0,
            grid=(B, N // tn),
            in_specs=[
                pl.BlockSpec((1, tn, C), lambda b, i: (b, i, 0)),   # x
                const_spec((1, C)), const_spec((1, C)),             # ln1 gamma/beta
                weight_spec((C, 3 * C)),                            # wqkv (bf16)
            ],
            out_specs=pl.BlockSpec((1, tn, 3 * C), lambda b, i: (b, i, 0))),
        compiler_params=pltpu.CompilerParams(
            dimension_semantics=("parallel", "parallel"),
            vmem_limit_bytes=_vmem_limit(vmem_a)),
        cost_estimate=pl.CostEstimate(
            flops=int(flops_a), transcendentals=int(B * N),
            bytes_accessed=int(bytes_a)),
    )(x, params["ln1_g"], params["ln1_b"], wqkv)

    # Head-major (B, H, N, hd) layout for the attention kernel (XLA transpose;
    # per-head access in-kernel becomes a free leading-dim index).
    qkv5 = qkv_flat.reshape(B, N, 3, num_heads, hd)
    q = jnp.transpose(qkv5[:, :, 0], (0, 2, 1, 3))   # (B, H, N, hd), pre-scaled
    k = jnp.transpose(qkv5[:, :, 1], (0, 2, 1, 3))
    v = jnp.transpose(qkv5[:, :, 2], (0, 2, 1, 3))

    # ---------------- pass 2: attention + projection + MLP ----------------
    kernel = functools.partial(_attn_mlp_kernel, num_heads=num_heads)
    flops_b = 4 * B * N * N * C + 6 * B * N * C * C + 20 * B * N * C
    transc_b = B * num_heads * N * N + B * N * (num_heads + 1)
    bytes_b = (2 * B * N * C * 4           # x read + out write (f32)
               + 3 * B * N * C * 2         # q, k, v reads (bf16)
               + 3 * C * C * 2             # wproj, w1, w2 (bf16)
               + 8 * C * 4)                # biases + LN params
    vmem_b = (2 * 2 * tq * C * 4           # x tile + out tile (double buf, f32)
              + 2 * tq * C * 2             # q tile (double buf, bf16)
              + 2 * 2 * N * C * 2          # k, v blocks (double buf, bf16)
              + 3 * C * C * 2              # weights (single buf, bf16)
              + 8 * C * 4
              + 2 * tq * N * 4             # score / prob transient (per head)
              + 6 * tq * C * 4)            # attn / proj / mlp transients

    return pl.pallas_call(
        kernel,
        out_shape=jax.ShapeDtypeStruct((B, N, C), jnp.float32),
        grid_spec=pltpu.PrefetchScalarGridSpec(
            num_scalar_prefetch=0,
            grid=(B, N // tq),
            in_specs=[
                pl.BlockSpec((1, tq, C), lambda b, i: (b, i, 0)),               # x
                pl.BlockSpec((1, num_heads, tq, hd), lambda b, i: (b, 0, i, 0)),  # q
                pl.BlockSpec((1, num_heads, N, hd), lambda b, i: (b, 0, 0, 0)),   # k
                pl.BlockSpec((1, num_heads, N, hd), lambda b, i: (b, 0, 0, 0)),   # v
                weight_spec((C, C)), const_spec((1, C)),          # proj W / b
                const_spec((1, C)), const_spec((1, C)),           # ln2 gamma/beta
                weight_spec((C, C)), const_spec((1, C)),          # linear1 W / b
                weight_spec((C, C)), const_spec((1, C)),          # linear2 W / b
            ],
            out_specs=pl.BlockSpec((1, tq, C), lambda b, i: (b, i, 0))),
        compiler_params=pltpu.CompilerParams(
            dimension_semantics=("parallel", "parallel"),
            vmem_limit_bytes=_vmem_limit(vmem_b)),
        cost_estimate=pl.CostEstimate(
            flops=int(flops_b), transcendentals=int(transc_b),
            bytes_accessed=int(bytes_b)),
    )(x, q, k, v,
      wproj, params["bproj"],
      params["ln2_g"], params["ln2_b"],
      w1, params["b1"],
      w2, params["b2"])


def transformer_block_ref(x, params, *, num_heads):
    """Pure-JAX f32 reference mirroring the PyTorch forward (pre_norm)."""
    B, N, C = x.shape
    hd = C // num_heads
    scale = float(hd) ** -0.5

    def ln(v, g, b):
        mu = jnp.mean(v, axis=-1, keepdims=True)
        var = jnp.mean((v - mu) ** 2, axis=-1, keepdims=True)
        return (v - mu) / jnp.sqrt(var + 1e-5) * g + b

    xn = ln(x, params["ln1_g"], params["ln1_b"])
    qkv = xn @ params["wqkv"]                                   # (B, N, 3C)
    qkv = qkv.reshape(B, N, 3, num_heads, hd).transpose(2, 0, 3, 1, 4)
    q, k, v = qkv[0], qkv[1], qkv[2]                            # (B, H, N, hd)
    attn = jnp.einsum("bhnd,bhmd->bhnm", q, k) * scale
    attn = jax.nn.softmax(attn, axis=-1)
    o = jnp.einsum("bhnm,bhmd->bhnd", attn, v)
    o = o.transpose(0, 2, 1, 3).reshape(B, N, C)
    o = o @ params["wproj"] + params["bproj"][0]
    x = x + o
    xn2 = ln(x, params["ln2_g"], params["ln2_b"])
    h1 = jnp.maximum(xn2 @ params["w1"] + params["b1"][0], 0.0)
    mlp = h1 @ params["w2"] + params["b2"][0]
    return x + mlp


def make_params(key, dim):
    ks = jax.random.split(key, 8)
    s = 0.02
    return {
        "ln1_g": jnp.ones((1, dim), jnp.float32),
        "ln1_b": jnp.zeros((1, dim), jnp.float32),
        "wqkv": s * jax.random.normal(ks[0], (dim, 3 * dim), jnp.float32),
        "wproj": s * jax.random.normal(ks[1], (dim, dim), jnp.float32),
        "bproj": s * jax.random.normal(ks[2], (1, dim), jnp.float32),
        "ln2_g": jnp.ones((1, dim), jnp.float32),
        "ln2_b": jnp.zeros((1, dim), jnp.float32),
        "w1": s * jax.random.normal(ks[3], (dim, dim), jnp.float32),
        "b1": s * jax.random.normal(ks[4], (1, dim), jnp.float32),
        "w2": s * jax.random.normal(ks[5], (dim, dim), jnp.float32),
        "b2": s * jax.random.normal(ks[6], (1, dim), jnp.float32),
    }


if __name__ == "__main__":
    B, N, C = 2, 8, 32
    num_heads = 4

    key = jax.random.PRNGKey(0)
    kx, kp = jax.random.split(key)
    x = jax.random.normal(kx, (B, N, C), jnp.float32)
    params = make_params(kp, C)

    out = transformer_block(x, params, num_heads=num_heads)
    out = jax.block_until_ready(out)

    ref = transformer_block_ref(x, params, num_heads=num_heads)
    # bf16 MXU operands / approx reciprocal vs f32 reference -> loose tolerance.
    np.testing.assert_allclose(np.asarray(out), np.asarray(ref),
                               rtol=2e-2, atol=2e-2)
    print("KERNEL_OK")
</pallas_src>

<mosaic_0001>
module attributes {stable_mosaic.version = 11 : i64} {
  func.func @_ln_qkv_kernel(%arg0: i32, %arg1: i32, %arg2: memref<1x8x32xf32, #tpu.memory_space<vmem>>, %arg3: memref<1x32xf32, #tpu.memory_space<vmem>>, %arg4: memref<1x32xf32, #tpu.memory_space<vmem>>, %arg5: memref<32x96xbf16, #tpu.memory_space<vmem>>, %arg6: memref<1x8x96xbf16, #tpu.memory_space<vmem>>) attributes {dimension_semantics = [#tpu.dimension_semantics<parallel>, #tpu.dimension_semantics<parallel>], iteration_bounds = array<i64: 2, 1>, scalar_prefetch = 0 : i64, scratch_operands = 0 : i64, tpu.core_type = #tpu.core_type<tc>, window_params = [{transform_indices = @transform_0, window_bounds = array<i64: 1, 8, 32>}, {pipeline_mode = #tpu.pipeline_mode<synchronous>, transform_indices = @transform_1, window_bounds = array<i64: 1, 32>}, {pipeline_mode = #tpu.pipeline_mode<synchronous>, transform_indices = @transform_2, window_bounds = array<i64: 1, 32>}, {pipeline_mode = #tpu.pipeline_mode<synchronous>, transform_indices = @transform_3, window_bounds = array<i64: 32, 96>}, {transform_indices = @transform_4, window_bounds = array<i64: 1, 8, 96>}]} {
    %c0 = arith.constant 0 : index
    %c0_0 = arith.constant 0 : index
    %c0_1 = arith.constant 0 : index
    %0 = vector.load %arg2[%c0, %c0_0, %c0_1] : memref<1x8x32xf32, #tpu.memory_space<vmem>>, vector<1x8x32xf32>
    %1 = vector.shape_cast %0 : vector<1x8x32xf32> to vector<8x32xf32>
    %c0_2 = arith.constant 0 : index
    %c0_3 = arith.constant 0 : index
    %2 = vector.load %arg3[%c0_2, %c0_3] : memref<1x32xf32, #tpu.memory_space<vmem>>, vector<1x32xf32>
    %c0_4 = arith.constant 0 : index
    %c0_5 = arith.constant 0 : index
    %3 = vector.load %arg4[%c0_4, %c0_5] : memref<1x32xf32, #tpu.memory_space<vmem>>, vector<1x32xf32>
    %cst = arith.constant dense<0.000000e+00> : vector<8xf32>
    %4 = vector.multi_reduction <add>, %1, %cst [1] : vector<8x32xf32> to vector<8xf32>
    %5 = vector.shape_cast %4 : vector<8xf32> to vector<8x1xf32>
    %cst_6 = arith.constant 3.200000e+01 : f32
    %6 = vector.broadcast %cst_6 : f32 to vector<8x1xf32>
    %7 = arith.divf %5, %6 : vector<8x1xf32>
    %8 = vector.broadcast %7 : vector<8x1xf32> to vector<8x32xf32>
    %9 = arith.subf %1, %8 : vector<8x32xf32>
    %10 = arith.mulf %9, %9 : vector<8x32xf32>
    %cst_7 = arith.constant dense<0.000000e+00> : vector<8xf32>
    %11 = vector.multi_reduction <add>, %10, %cst_7 [1] : vector<8x32xf32> to vector<8xf32>
    %12 = vector.shape_cast %11 : vector<8xf32> to vector<8x1xf32>
    %cst_8 = arith.constant 3.200000e+01 : f32
    %13 = vector.broadcast %cst_8 : f32 to vector<8x1xf32>
    %14 = arith.divf %12, %13 : vector<8x1xf32>
    %15 = vector.broadcast %7 : vector<8x1xf32> to vector<8x32xf32>
    %16 = arith.subf %1, %15 : vector<8x32xf32>
    %cst_9 = arith.constant 9.99999974E-6 : f32
    %17 = vector.broadcast %cst_9 : f32 to vector<8x1xf32>
    %18 = arith.addf %14, %17 : vector<8x1xf32>
    %19 = math.rsqrt %18 : vector<8x1xf32>
    %20 = vector.broadcast %19 : vector<8x1xf32> to vector<8x32xf32>
    %21 = arith.mulf %16, %20 : vector<8x32xf32>
    %22 = vector.broadcast %2 : vector<1x32xf32> to vector<8x32xf32>
    %23 = arith.mulf %21, %22 : vector<8x32xf32>
    %24 = vector.broadcast %3 : vector<1x32xf32> to vector<8x32xf32>
    %25 = arith.addf %23, %24 : vector<8x32xf32>
    %26 = arith.truncf %25 : vector<8x32xf32> to vector<8x32xbf16>
    %c0_10 = arith.constant 0 : index
    %c0_11 = arith.constant 0 : index
    %27 = vector.load %arg5[%c0_10, %c0_11] : memref<32x96xbf16, #tpu.memory_space<vmem>>, vector<32x96xbf16>
    %cst_12 = arith.constant dense<0.000000e+00> : vector<8x96xf32>
    %28 = tpu.matmul %26, %27, %cst_12 {dimension_numbers = #tpu.dot_dimension_numbers<[1], [0], [0], [1], [0, 0, 1, 1], [], []>} : vector<8x32xbf16>, vector<32x96xbf16>, vector<8x96xf32> -> vector<8x96xf32>
    %29 = arith.truncf %28 : vector<8x96xf32> to vector<8x96xbf16>
    %c0_13 = arith.constant 0 : index
    %c0_14 = arith.constant 0 : index
    %c0_15 = arith.constant 0 : index
    %30 = vector.load %arg6[%c0_13, %c0_14, %c0_15] : memref<1x8x96xbf16, #tpu.memory_space<vmem>>, vector<1x8x96xbf16>
    %31 = vector.shape_cast %30 : vector<1x8x96xbf16> to vector<8x96xbf16>
    %32 = vector.shape_cast %29 : vector<8x96xbf16> to vector<1x8x96xbf16>
    tpu.vector_store %arg6[%c0_13, %c0_14, %c0_15], %32 {strides = array<i32>} : memref<1x8x96xbf16, #tpu.memory_space<vmem>>, vector<1x8x96xbf16>,
    return
  }
  func.func @transform_0(%arg0: i32, %arg1: i32) -> (i32, i32, i32) {
    %c0_i32 = arith.constant 0 : i32
    %c0_i32_0 = arith.constant 0 : i32
    return %arg0, %arg1, %c0_i32 : i32, i32, i32
  }
  func.func @transform_1(%arg0: i32, %arg1: i32) -> (i32, i32) {
    %c0_i32 = arith.constant 0 : i32
    %c0_i32_0 = arith.constant 0 : i32
    %c0_i32_1 = arith.constant 0 : i32
    return %c0_i32, %c0_i32_0 : i32, i32
  }
  func.func @transform_2(%arg0: i32, %arg1: i32) -> (i32, i32) {
    %c0_i32 = arith.constant 0 : i32
    %c0_i32_0 = arith.constant 0 : i32
    %c0_i32_1 = arith.constant 0 : i32
    return %c0_i32, %c0_i32_0 : i32, i32
  }
  func.func @transform_3(%arg0: i32, %arg1: i32) -> (i32, i32) {
    %c0_i32 = arith.constant 0 : i32
    %c0_i32_0 = arith.constant 0 : i32
    %c0_i32_1 = arith.constant 0 : i32
    return %c0_i32, %c0_i32_0 : i32, i32
  }
  func.func @transform_4(%arg0: i32, %arg1: i32) -> (i32, i32, i32) {
    %c0_i32 = arith.constant 0 : i32
    %c0_i32_0 = arith.constant 0 : i32
    return %arg0, %arg1, %c0_i32 : i32, i32, i32
  }
}

</mosaic_0001>

<bundles_post_ra>
// kernel: tpu_custom_call.1
= control target key start
LH: loop header
LB: loop body
LE: loop exit
PB: predicated region body
PF: predicated region fallthrough
CT: control target
= control target key end

     0   :  { %9 = vsyncpa [#allocation3], 0  ;;  %s938_s0 = inlined_call_operand.hbm [shape: f32[2,8,32], index: 0, kind: input, shape index: {}]   ;;  %s939_s1 = inlined_call_operand.hbm [shape: f32[1,32], index: 1, kind: input, shape index: {}]   ;;  %s940_s2 = inlined_call_operand.vmem [shape: f32[1,32], index: 2, kind: input, shape index: {}]   ;;  %s941_s3 = inlined_call_operand.hbm [shape: bf16[32,96], index: 3, kind: input, shape index: {}]   ;;  %s942_s4 = inlined_call_operand.hbm [shape: bf16[2,8,96], index: 4, kind: output, shape index: {}]  }
   0x1   :  { %11 = vsyncpa [#allocation3 + $0x1], 0 }
   0x2   :  { %12 = vsyncpa [#allocation6], 0 }
   0x3   :  { %13 = vsyncpa [#allocation4], 0 }
   0x4   :  { %15 = vsyncpa [#allocation4 + $0x1], 0  ;;  %s785_s15 = smov 0   ;;  %s787_s16 = smov 0  }
   0x5   :  { %s789_s17 = smov 0   ;;  %s791_s18 = smov 0  }
   0x6   :  { %s793_s19 = smov 0   ;;  %s795_s20 = smov 0  }
   0x7 LB: > { %s457_s21 = sadd.s32 4294967295, %s753_s20   ;;  %s458_s22 = sadd.s32 4294967294, %s753_s20   ;;  %s753_s20 = sphi %s795_s20, %s21_s20   ;;  %s749_s19 = sphi %s793_s19, %s952_s19   ;;  %s745_s18 = sphi %s791_s18, %s951_s18   ;;  %s741_s17 = sphi %s789_s17, %s950_s17   ;;  %s737_s16 = sphi %s787_s16, %s949_s16   ;;  %s733_s15 = sphi %s785_s15, %s948_s15  }
   0x8   : > { %p55_p0 = scmp.ne.s32.totalorder %s737_s16, %s733_s15  ;;  %p821_p1 = scmp.eq.s32.totalorder %s457_s21, 0 }
   0x9   : > { %p150_p2 = scmp.eq.s32.totalorder %s458_s22, 1  ;;  %p459_p4 = scmp.ge.s32.totalorder %s753_s20, 1 }
   0xa   : > { %p827_p3 = por %p821_p1, %p55_p0  ;;  %p157_p6 = scmp.lt.s32.totalorder %s753_s20, 3 }
   0xb   : > { %p832_p5 = por %p150_p2, %p55_p0  ;;  %s169_s28 = sshll.u32 %s939_s1, 4  ;;  %s170_s28 = int_to_ptr.hbm [resolvable:$true] %s169_s28 }
   0xc   : > { %p840_p7 = pnand %p459_p4, %p157_p6  ;;  %p462_p8 = scmp.ge.s32.totalorder %s753_s20, 2 }
   0xd   : > { %s755_s30 = smov [#allocation5]   ;;  %s183_s8 = sshll.u32 %s941_s3, 4  ;;  %s184_s8 = int_to_ptr.hbm [resolvable:$true] %s183_s8 }
   0xe   : > { %p497_p9 = pneg %p840_p7  ;;  %s171_s5 = sshll.u32 %s755_s30, 4  ;;  %s172_s5 = int_to_ptr.vmem [resolvable:$true] %s171_s5 }
   0xf   : > { %s756_s9 = smov [#allocation7]   ;;  %s757_s11 = smov 64  }
  0x10   : > { %p498_p10 = pnand %p497_p9, %p821_p1  ;;  %s185_s10 = sshll.u32 %s756_s9, 4  ;;  %s186_s10 = int_to_ptr.vmem [resolvable:$true] %s185_s10 }
  0x11   : > { %s758_s12 = smov 4   ;;  %p144_p11 = scmp.eq.s32.totalorder %s457_s21, 1 }
  0x12   : > { %500 = dma.hbm_to_vmem [thread:$0]  (!%p498_p10), %s170_s28, 16, %s172_s5, [#allocation6]  }
  0x13   : > { %503 = dma.hbm_to_vmem [thread:$0]  (!%p498_p10), %s184_s8, 256, %s186_s10, [#allocation6], %s757_s11, %s757_s11, %s758_s12  }
  0x14   : > { %s33_s13 = sadd.s32 1, %s749_s19  ;;  %s42_s14 = sadd.s32 1, %s741_s17 }
  0x15   : > { %p35_p12 = scmp.ge.s32.totalorder %s33_s13, 2  ;;  %p49_p13 = scmp.ne.s32.totalorder %s741_s17, %s737_s16 }
  0x16   : > { %p50_p0 = scmp.eq.s32.totalorder %s753_s20, 0  ;;  %p514_p4 = scmp.lt.s32.totalorder %s753_s20, 2 }
  0x17   : > { %s954_s13 = smov (%p35_p12, %s33_s13), 0  ;;  %p861_p2 = por %p144_p11, %p49_p13 }
  0x18   : > { %s37_s26 = ssub.s32 %s749_s19, %s954_s13  ;;  %s199_s27 = sand.u32 1, %s741_s17  }
  0x19   : > { %p40_p6 = scmp.eq.s32.totalorder %s37_s26, 0  ;;  %p51_p9 = por %p50_p0, %p49_p13 }
  0x1a   : > { %s463_s28 = sshll.u32 %s199_s27, 3  ;;  %s464_s21 = sshll.u32 %s749_s19, 3 }
  0x1b   : > { %s871_s30 = scalar_select %p40_p6, %s741_s17, %s42_s14  }
  0x1c   : > { %s208_s7 = scalar_lea.hbm %s938_s0, %s464_s21  ;;  %s203_s9 = scalar_lea.vmem [#allocation2], %s463_s28 }
  0x1d   : > { %s210_s8 = sshll.u32 %s208_s7, 4  ;;  %s212_s10 = sshll.u32 %s203_s9, 4  ;;  %s211_s8 = int_to_ptr.hbm [resolvable:$true] %s210_s8  ;;  %s213_s10 = int_to_ptr.vmem [resolvable:$true] %s212_s10 }
  0x1e   : > { %p505_p10 = pnand %p514_p4, %p51_p9  ;;  %s200_s11 = scalar_lea.sflag [#allocation3], %s199_s27 }
  0x1f   : > { %221 = sbr.rel (%p840_p7) target bundleno = 444 (0x1bc), region = 36  ;;  %s881_s12 = sand.u32 (!%p840_p7), 1, %s737_s16  }
  0x20   : > { %507 = dma.hbm_to_vmem [thread:$0]  (!%p505_p10), %s211_s8, 128, %s213_s10, %s200_s11  }
  0x21   : > { %s466_s14 = sshll.u32 (!%p840_p7), %s881_s12, 3  ;;  %s224_s26 = scalar_lea.sflag (!%p840_p7), [#allocation3], %s881_s12 }
  0x22   : > { %s227_s21 = scalar_lea.vmem (!%p840_p7), [#allocation2], %s466_s14 }
  0x24   : > { %720 = dma.done.wait (%p827_p3), %s224_s26, 128  }
  0x25   : > { %722 = vsyncadd (%p827_p3), %s224_s26, 4294967168 }
  0x26   : > { %724 = dma.done.wait (%p821_p1), [#allocation6], 272  }
  0x27   : > { %726 = vsyncadd (%p821_p1), [#allocation6], 4294967024  ;;  %vm267_vm0 = vcmask 261120   ;;  %v264_v0 = vld [vmem:[%s227_s21] sm:$0xff]  ;;  %v759_v2 = vmov 32.0   ;;  %v483_v15 = vld [vmem:[#allocation7] sm:$0xff] }
  0x28   : > { %v268_v1 = vsel %vm267_vm0, %v264_v0, 0.0  ;;  %573 = vrcp.f32 %v759_v2  ;;  %v484_v14 = vld [vmem:[#allocation7 + $0x8] sm:$0xff]  ;;  %v571_v25 = vld [vmem:[#allocation5] ss:$0 sm:$0xff]  ;;  %s480_s29 = sshll.u32 %s745_s18, 2  ;;  %s469_s27 = sshll.u32 %s881_s12, 2 }
  0x29   : > { %269 = vadd.xlane.f32.xlu0 %v268_v1  ;;  %331 = vmatpush.bf16.msra.mxu0 %v484_v14  ;;  %v572_v28 = vld [vmem:[%s940_s2] ss:$0 sm:$0xff]  ;;  %s353_s6 = scalar_lea.hbm %s942_s4, %s480_s29  ;;  %s262_s7 = scalar_lea.vmem [#allocation8], %s469_s27  ;;  %vm339_vm5 = vcmask 781312  }
  0x2a   : > { %s355_s8 = sshll.u32 %s262_s7, 4  ;;  %s357_s9 = sshll.u32 %s353_s6, 4  ;;  %s356_s8 = int_to_ptr.vmem [resolvable:$true] %s355_s8  ;;  %s358_s9 = int_to_ptr.hbm [resolvable:$true] %s357_s9 }
  0x2b   : > { %s342_s10 = scalar_lea.sflag [#allocation4], %s881_s12  ;;  %s681_s11 = sshra.s32 %s358_s9, 4  ;;  %s682_s11 = int_to_ptr.hbm [resolvable:$true] %s681_s11 }
  0x2c   : > { %s683_s14 = scalar_lea.hbm %s682_s11, 4  ;;  %s687_s21 = scalar_lea.hbm %s942_s4, 8 }
  0x2d   : > { %332 = vmatpush.bf16.msra.mxu0 %v483_v15  ;;  %p684_p1 = scmp.ne.s32.totalorder %s682_s11, %s683_s14  ;;  %p688_p11 = scmp.lt.s32.totalorder %s682_s11, %s942_s4 }
  0x2e   : > { %v574_v3 = vpop.eup %573  ;;  %p689_p12 = scmp.lt.s32.totalorder %s687_s21, %s683_s14 }
  0x2f   : > { %v272_v4 = vmul.f32 32.0, %v574_v3  ;;  %vm276_vm1 = vweird.f32 %v574_v3  ;;  %p685_p3 = pnand %p684_p1, %p861_p2 }
  0x30   : > { %p690_p13 = por %p689_p12, %p688_p11 }
  0x31   : > { %v273_v5 = vsub.f32 1.0, %v272_v4  ;;  %p686_p7 = pneg %p685_p3 }
  0x33   : > { %v274_v6 = vmul.f32 %v574_v3, %v273_v5  ;;  %p691_p0 = pnand %p690_p13, %p686_p7 }
  0x35   : > { %v275_v7 = vadd.f32 %v574_v3, %v274_v6 }
  0x37   : > { %v277_v8 = vsel %vm276_vm1, %v574_v3, %v275_v7 }
  0x9c   : > { %v270_v9 = vpop.xlane.xlu0 %269 }
  0x9d   : > { %v278_v10 = vmul.f32 %v277_v8, %v270_v9 }
  0x9f   : > { %v279_v11 = vsub.f32 %v264_v0, %v278_v10 }
  0xa1   : > { %v280_v12 = vmul.f32 %v279_v11, %v279_v11 }
  0xa3   : > { %v281_v13 = vsel %vm267_vm0, %v280_v12, 0.0 }
  0xa4   : > { %282 = vadd.xlane.f32.xlu0 %v281_v13 }
 0x117   : > { %v283_v16 = vpop.xlane.xlu0 %282 }
 0x118   : > { %v284_v17 = vmul.f32 %v283_v16, %v277_v8 }
 0x11a   : > { %v285_v18 = vadd.f32 1e-05, %v284_v17 }
 0x11c   : > { %575 = vrsqrt.f32 %v285_v18  ;;  %vm292_vm3 = vweird.f32 %v285_v18 }
 0x122   : > { %v576_v19 = vpop.eup %575 }
 0x123   : > { %v287_v20 = vmul.f32 %v576_v19, %v285_v18  ;;  %vm293_vm2 = vweird.f32 %v576_v19 }
 0x124   : > { %vm294_vm4 = vmor %vm292_vm3, %vm293_vm2 }
 0x125   : > { %v288_v21 = vmul.f32 %v576_v19, %v287_v20 }
 0x127   : > { %v289_v22 = vmul.f32 0.5, %v288_v21 }
 0x129   : > { %v290_v23 = vsub.f32 1.5, %v289_v22 }
 0x12b   : > { %v291_v24 = vmul.f32 %v576_v19, %v290_v23 }
 0x12d   : > { %v295_v26 = vsel %vm294_vm4, %v576_v19, %v291_v24 }
 0x12e   : > { %v296_v27 = vmul.f32 %v295_v26, %v279_v11 }
 0x130   : > { %v300_v29 = vmul.f32 %v571_v25, %v296_v27 }
 0x132   : > { %v304_v30 = vadd.f32 %v572_v28, %v300_v29 }
 0x134   : > { %v305_v31 = vpack.c.bf16 %v304_v30, %v304_v30 }
 0x136   : > { %478 = vmatmul.msk.bf16.vlgmr.msra.gmra.mxu0 %vm267_vm0, %v305_v31 }
 0x1b3   : > { %v334_v32 = vpop.f32.mrf.mxu0 }
 0x1b4   : > { %v338_v33 = vpack.c.bf16 %v334_v32, %v334_v32 }
 0x1b6   : > { %340 = vst.msk [vmem:[%s262_s7] sm:$0xf] %vm339_vm5, %v338_v33 }
 0x1b7   : > { %694 = shalt.err (!%p691_p0)
}
 0x1b8   : > { %495 = dma.vmem_to_hbm [thread:$0]  (%p861_p2), %s356_s8, 64, %s358_s9, %s342_s10  }
 0x1bb   : > { %v336_v34 = vpop.f32.mrf.mxu0 }
 0x1bc PF: > { %s369_s12 = sand.u32 1, %s733_s15   ;;  %p509_p4 = pnand %p462_p8, %p832_p5 }
 0x1bd   : > { %s370_s29 = scalar_lea.sflag [#allocation4], %s369_s12 }
 0x1be   : > { %p510_p6 = pneg %p509_p4 }
 0x1c0   : > { %728 = dma.done.wait (%p510_p6), %s370_s29, 64  }
 0x1c1   : > { %730 = vsyncadd (%p510_p6), %s370_s29, 4294967232  ;;  %s21_s20 = sadd.s32 1, %s753_s20   ;;  %s948_s15 = smov %s737_s16 }
 0x1c2   : > { %p18_p9 = scmp.ge.s32.totalorder %s21_s20, 4   ;;  %s949_s16 = smov %s741_s17 }
 0x1c3   : > { %s950_s17 = smov %s871_s30  ;;  %s951_s18 = smov %s749_s19 }
 0x1c4   : > { %s952_s19 = smov %s954_s13  ;;  %20 = sbr.rel (!%p18_p9) target bundleno = 7 (0x7), region = 89 }
 0x1c9   :  { %376 = vsyncpa [#allocation3], 1 }
 0x1ca   :  { %378 = vsyncpa [#allocation3 + $0x1], 1 }
 0x1cb   :  { %379 = vsyncpa [#allocation6], 1 }
 0x1cc   :  { %380 = vsyncpa [#allocation4], 1 }
 0x1cd   :  { %382 = vsyncpa [#allocation4 + $0x1], 1 }

</bundles_post_ra>
